<compile_context>
chip_gen: v5e
topology: v5e:2x2
jax: 0.10.0
libtpu: 0.0.40
codegen_flags: <defaults>
</compile_context>

<pallas_src>
import functools
import math

import jax
import jax.numpy as jnp
from jax.experimental import pallas as pl
from jax.experimental.pallas import tpu as pltpu


# ---------------------------------------------------------------------------
# Fused kernel: QKV projection (one 2-D matmul) + per-head agent attention.
# ---------------------------------------------------------------------------
def fused_selfattn_kernel(x_ref, m_ref, b_ref, o_ref, *, H, Fq, Fv, OqT):
    # x_ref: (A, C*T)        channel-major flattened input rows (free view of x)
    # m_ref: (C*T, Wtot)     kron-expanded [Wq*scale | Wk | Wv] weights
    # b_ref: (1, Wtot)       matching expanded biases
    # o_ref: (A, C*T)        output slab (channel-major flattened, lane dense)
    qkv = (
        jnp.dot(x_ref[...], m_ref[...], preferred_element_type=jnp.float32)
        + b_ref[...]
    )  # (A, Wtot); columns = [Q | K | V], each head-major then (d*T + t)

    outs = []
    for h in range(H):  # static unrolled head loop (H is tiny)
        q = qkv[:, h * Fq:(h + 1) * Fq]                           # (A, Fq)
        k = qkv[:, OqT + h * Fq: OqT + (h + 1) * Fq]              # (A, Fq)
        v = qkv[:, 2 * OqT + h * Fv: 2 * OqT + (h + 1) * Fv]      # (A, Fv)

        # dots = q . k ; 1/sqrt(Fq) already folded into the Q weights/bias.
        dots = jax.lax.dot_general(
            q, k, (((1,), (1,)), ((), ())),
            preferred_element_type=jnp.float32)                   # (A, A)
        dots = dots - jnp.max(dots, axis=-1, keepdims=True)       # stable softmax (f32)
        p = jnp.exp(dots)                                          # EUP
        inv = pl.reciprocal(jnp.sum(p, axis=-1, keepdims=True), approx=True)
        attn = p * inv
        outs.append(jnp.dot(attn, v, preferred_element_type=jnp.float32))

    # Single lane-dense (A, H*Fv) = (A, C*T) unmasked store.
    o_ref[...] = jnp.concatenate(outs, axis=-1)


# ---------------------------------------------------------------------------
# Wrapper: weight expansion (once, tiny) + one pallas_call + free reshapes.
# ---------------------------------------------------------------------------
def self_attention_forward(x, params, nheads, qk_nc, v_nc):
    B, A, C, T = x.shape
    H, Dq, Dv = nheads, qk_nc, v_nc
    assert H * Dv == C, "v_n_channels * nheads must equal n_channels"
    Oq, Ov = H * Dq, H * Dv
    Fq, Fv = Dq * T, Dv * T
    OqT = Oq * T
    Wtot = (2 * Oq + Ov) * T
    scale = 1.0 / math.sqrt(Fq)

    # Kronecker-expand the 1x1 conv weights so the projection acts directly on
    # the (A, C*T) channel-major-flattened rows:  M[c*T+t', o*T+t] = W[c,o]*(t==t')
    # (In a real model this expansion is parameter-only and would be hoisted /
    #  cached per weight update; it is a few-KiB computation either way.)
    eye_t = jnp.eye(T, dtype=jnp.float32)
    Mq = jnp.kron(params["wq"].astype(jnp.float32) * scale, eye_t)   # (C*T, Oq*T)
    Mk = jnp.kron(params["wk"].astype(jnp.float32), eye_t)           # (C*T, Oq*T)
    Mv = jnp.kron(params["wv"].astype(jnp.float32), eye_t)           # (C*T, Ov*T)
    M = jnp.concatenate([Mq, Mk, Mv], axis=1)                        # (C*T, Wtot)
    bias = jnp.concatenate([
        jnp.repeat(params["bq"].astype(jnp.float32) * scale, T),
        jnp.repeat(params["bk"].astype(jnp.float32), T),
        jnp.repeat(params["bv"].astype(jnp.float32), T),
    ])[None, :]                                                      # (1, Wtot)

    x_slab = x.reshape(B, A, C * T)          # free view, no transpose

    out = pl.pallas_call(
        functools.partial(fused_selfattn_kernel, H=H, Fq=Fq, Fv=Fv, OqT=OqT),
        out_shape=jax.ShapeDtypeStruct((B, A, C * T), jnp.float32),
        grid=(B,),
        in_specs=[
            pl.BlockSpec((None, A, C * T), lambda b: (b, 0, 0)),
            pl.BlockSpec((C * T, Wtot), lambda b: (0, 0)),   # resident across steps
            pl.BlockSpec((1, Wtot), lambda b: (0, 0)),       # resident across steps
        ],
        out_specs=pl.BlockSpec((None, A, C * T), lambda b: (b, 0, 0)),
        compiler_params=pltpu.CompilerParams(dimension_semantics=("parallel",)),
    )(x_slab, M, bias)

    return out.reshape(B, A, C, T)           # free view, no transpose


# ---------------------------------------------------------------------------
# Pure-JAX reference (mirrors the PyTorch forward exactly)
# ---------------------------------------------------------------------------
def reference_forward(x, params, nheads, qk_nc, v_nc):
    B, A, C, T = x.shape
    H, Dq, Dv = nheads, qk_nc, v_nc
    xf = x.reshape(B * A, C, T)

    def conv1x1(w, b):  # w: (C, O), b: (O,)
        return jnp.einsum("co,nct->not", w, xf) + b[None, :, None]

    q = conv1x1(params["wq"], params["bq"])
    k = conv1x1(params["wk"], params["bk"])
    v = conv1x1(params["wv"], params["bv"])

    def rearr(z, D):
        return (
            z.reshape(B, A, H, D, T)
            .transpose(2, 0, 1, 3, 4)
            .reshape(H, B, A, D * T)
        )

    q, k, v = rearr(q, Dq), rearr(k, Dq), rearr(v, Dv)
    dots = jnp.einsum("hbif,hbjf->hbij", q, k) / math.sqrt(q.shape[-1])
    attn = jax.nn.softmax(dots, axis=-1)
    out = jnp.einsum("hbij,hbjf->hbif", attn, v)
    return out.transpose(1, 2, 0, 3).reshape(B, A, C, T)


if __name__ == "__main__":
    # module config: n_channels=8, qk_n_channels=4, v_n_channels=2, nheads=4
    B, A, C, T = 2, 8, 8, 16
    H, Dq, Dv = 4, 4, 2  # H * Dv == C (required by the module's final reshape)

    key = jax.random.PRNGKey(0)
    kx, kwq, kbq, kwk, kbk, kwv, kbv = jax.random.split(key, 7)
    params = dict(
        wq=0.2 * jax.random.normal(kwq, (C, H * Dq), jnp.float32),
        bq=0.2 * jax.random.normal(kbq, (H * Dq,), jnp.float32),
        wk=0.2 * jax.random.normal(kwk, (C, H * Dq), jnp.float32),
        bk=0.2 * jax.random.normal(kbk, (H * Dq,), jnp.float32),
        wv=0.2 * jax.random.normal(kwv, (C, H * Dv), jnp.float32),
        bv=0.2 * jax.random.normal(kbv, (H * Dv,), jnp.float32),
    )
    x = jax.random.normal(kx, (B, A, C, T), jnp.float32)

    out = self_attention_forward(x, params, H, Dq, Dv)
    out = jax.block_until_ready(out)

    ref = reference_forward(x, params, H, Dq, Dv)
    assert out.shape == x.shape
    # Tolerance 2e-3: approx (EUP) reciprocal in the softmax normalisation.
    if not jnp.allclose(out, ref, rtol=2e-3, atol=2e-3):
        err = float(jnp.max(jnp.abs(out - ref)))
        raise AssertionError(f"mismatch vs reference, max abs err = {err}")

    print("KERNEL_OK")
</pallas_src>

<mosaic_0001>
module attributes {stable_mosaic.version = 11 : i64} {
  func.func @fused_selfattn_kernel(%arg0: i32, %arg1: memref<1x8x128xf32, #tpu.memory_space<vmem>>, %arg2: memref<128x640xf32, #tpu.memory_space<vmem>>, %arg3: memref<1x640xf32, #tpu.memory_space<vmem>>, %arg4: memref<1x8x128xf32, #tpu.memory_space<vmem>>) attributes {dimension_semantics = [#tpu.dimension_semantics<parallel>], iteration_bounds = array<i64: 2>, scalar_prefetch = 0 : i64, scratch_operands = 0 : i64, tpu.core_type = #tpu.core_type<tc>, window_params = [{transform_indices = @transform_0, window_bounds = array<i64: 1, 8, 128>}, {pipeline_mode = #tpu.pipeline_mode<synchronous>, transform_indices = @transform_1, window_bounds = array<i64: 128, 640>}, {pipeline_mode = #tpu.pipeline_mode<synchronous>, transform_indices = @transform_2, window_bounds = array<i64: 1, 640>}, {transform_indices = @transform_3, window_bounds = array<i64: 1, 8, 128>}]} {
    %c0 = arith.constant 0 : index
    %c0_0 = arith.constant 0 : index
    %c0_1 = arith.constant 0 : index
    %0 = vector.load %arg1[%c0, %c0_0, %c0_1] : memref<1x8x128xf32, #tpu.memory_space<vmem>>, vector<1x8x128xf32>
    %1 = vector.shape_cast %0 : vector<1x8x128xf32> to vector<8x128xf32>
    %c0_2 = arith.constant 0 : index
    %c0_3 = arith.constant 0 : index
    %2 = vector.load %arg2[%c0_2, %c0_3] : memref<128x640xf32, #tpu.memory_space<vmem>>, vector<128x640xf32>
    %cst = arith.constant dense<0.000000e+00> : vector<8x640xf32>
    %3 = tpu.matmul %1, %2, %cst {dimension_numbers = #tpu.dot_dimension_numbers<[1], [0], [0], [1], [0, 0, 1, 1], [], []>} : vector<8x128xf32>, vector<128x640xf32>, vector<8x640xf32> -> vector<8x640xf32>
    %c0_4 = arith.constant 0 : index
    %c0_5 = arith.constant 0 : index
    %4 = vector.load %arg3[%c0_4, %c0_5] : memref<1x640xf32, #tpu.memory_space<vmem>>, vector<1x640xf32>
    %5 = vector.broadcast %4 : vector<1x640xf32> to vector<8x640xf32>
    %6 = arith.addf %3, %5 : vector<8x640xf32>
    %7 = vector.extract_strided_slice %6 {offsets = [0, 0], sizes = [8, 64], strides = [1, 1]} : vector<8x640xf32> to vector<8x64xf32>
    %8 = vector.extract_strided_slice %6 {offsets = [0, 256], sizes = [8, 64], strides = [1, 1]} : vector<8x640xf32> to vector<8x64xf32>
    %9 = vector.extract_strided_slice %6 {offsets = [0, 512], sizes = [8, 32], strides = [1, 1]} : vector<8x640xf32> to vector<8x32xf32>
    %cst_6 = arith.constant dense<0.000000e+00> : vector<8x8xf32>
    %10 = tpu.matmul %7, %8, %cst_6 {dimension_numbers = #tpu.dot_dimension_numbers<[1], [1], [0], [0], [0, 0, 1, 0], [], []>} : vector<8x64xf32>, vector<8x64xf32>, vector<8x8xf32> -> vector<8x8xf32>
    %cst_7 = arith.constant dense<0xFF800000> : vector<8xf32>
    %11 = vector.multi_reduction <maximumf>, %10, %cst_7 [1] : vector<8x8xf32> to vector<8xf32>
    %12 = vector.shape_cast %11 : vector<8xf32> to vector<8x1xf32>
    %13 = vector.broadcast %12 : vector<8x1xf32> to vector<8x8xf32>
    %14 = arith.subf %10, %13 : vector<8x8xf32>
    %15 = math.exp %14 : vector<8x8xf32>
    %cst_8 = arith.constant dense<0.000000e+00> : vector<8xf32>
    %16 = vector.multi_reduction <add>, %15, %cst_8 [1] : vector<8x8xf32> to vector<8xf32>
    %17 = vector.shape_cast %16 : vector<8xf32> to vector<8x1xf32>
    %18 = tpu.reciprocal %17 {approx = true} : vector<8x1xf32> -> vector<8x1xf32>
    %19 = vector.broadcast %18 : vector<8x1xf32> to vector<8x8xf32>
    %20 = arith.mulf %15, %19 : vector<8x8xf32>
    %cst_9 = arith.constant dense<0.000000e+00> : vector<8x32xf32>
    %21 = tpu.matmul %20, %9, %cst_9 {dimension_numbers = #tpu.dot_dimension_numbers<[1], [0], [0], [1], [0, 0, 1, 1], [], []>} : vector<8x8xf32>, vector<8x32xf32>, vector<8x32xf32> -> vector<8x32xf32>
    %22 = vector.extract_strided_slice %6 {offsets = [0, 64], sizes = [8, 64], strides = [1, 1]} : vector<8x640xf32> to vector<8x64xf32>
    %23 = vector.extract_strided_slice %6 {offsets = [0, 320], sizes = [8, 64], strides = [1, 1]} : vector<8x640xf32> to vector<8x64xf32>
    %24 = vector.extract_strided_slice %6 {offsets = [0, 544], sizes = [8, 32], strides = [1, 1]} : vector<8x640xf32> to vector<8x32xf32>
    %cst_10 = arith.constant dense<0.000000e+00> : vector<8x8xf32>
    %25 = tpu.matmul %22, %23, %cst_10 {dimension_numbers = #tpu.dot_dimension_numbers<[1], [1], [0], [0], [0, 0, 1, 0], [], []>} : vector<8x64xf32>, vector<8x64xf32>, vector<8x8xf32> -> vector<8x8xf32>
    %cst_11 = arith.constant dense<0xFF800000> : vector<8xf32>
    %26 = vector.multi_reduction <maximumf>, %25, %cst_11 [1] : vector<8x8xf32> to vector<8xf32>
    %27 = vector.shape_cast %26 : vector<8xf32> to vector<8x1xf32>
    %28 = vector.broadcast %27 : vector<8x1xf32> to vector<8x8xf32>
    %29 = arith.subf %25, %28 : vector<8x8xf32>
    %30 = math.exp %29 : vector<8x8xf32>
    %cst_12 = arith.constant dense<0.000000e+00> : vector<8xf32>
    %31 = vector.multi_reduction <add>, %30, %cst_12 [1] : vector<8x8xf32> to vector<8xf32>
    %32 = vector.shape_cast %31 : vector<8xf32> to vector<8x1xf32>
    %33 = tpu.reciprocal %32 {approx = true} : vector<8x1xf32> -> vector<8x1xf32>
    %34 = vector.broadcast %33 : vector<8x1xf32> to vector<8x8xf32>
    %35 = arith.mulf %30, %34 : vector<8x8xf32>
    %cst_13 = arith.constant dense<0.000000e+00> : vector<8x32xf32>
    %36 = tpu.matmul %35, %24, %cst_13 {dimension_numbers = #tpu.dot_dimension_numbers<[1], [0], [0], [1], [0, 0, 1, 1], [], []>} : vector<8x8xf32>, vector<8x32xf32>, vector<8x32xf32> -> vector<8x32xf32>
    %37 = vector.extract_strided_slice %6 {offsets = [0, 128], sizes = [8, 64], strides = [1, 1]} : vector<8x640xf32> to vector<8x64xf32>
    %38 = vector.extract_strided_slice %6 {offsets = [0, 384], sizes = [8, 64], strides = [1, 1]} : vector<8x640xf32> to vector<8x64xf32>
    %39 = vector.extract_strided_slice %6 {offsets = [0, 576], sizes = [8, 32], strides = [1, 1]} : vector<8x640xf32> to vector<8x32xf32>
    %cst_14 = arith.constant dense<0.000000e+00> : vector<8x8xf32>
    %40 = tpu.matmul %37, %38, %cst_14 {dimension_numbers = #tpu.dot_dimension_numbers<[1], [1], [0], [0], [0, 0, 1, 0], [], []>} : vector<8x64xf32>, vector<8x64xf32>, vector<8x8xf32> -> vector<8x8xf32>
    %cst_15 = arith.constant dense<0xFF800000> : vector<8xf32>
    %41 = vector.multi_reduction <maximumf>, %40, %cst_15 [1] : vector<8x8xf32> to vector<8xf32>
    %42 = vector.shape_cast %41 : vector<8xf32> to vector<8x1xf32>
    %43 = vector.broadcast %42 : vector<8x1xf32> to vector<8x8xf32>
    %44 = arith.subf %40, %43 : vector<8x8xf32>
    %45 = math.exp %44 : vector<8x8xf32>
    %cst_16 = arith.constant dense<0.000000e+00> : vector<8xf32>
    %46 = vector.multi_reduction <add>, %45, %cst_16 [1] : vector<8x8xf32> to vector<8xf32>
    %47 = vector.shape_cast %46 : vector<8xf32> to vector<8x1xf32>
    %48 = tpu.reciprocal %47 {approx = true} : vector<8x1xf32> -> vector<8x1xf32>
    %49 = vector.broadcast %48 : vector<8x1xf32> to vector<8x8xf32>
    %50 = arith.mulf %45, %49 : vector<8x8xf32>
    %cst_17 = arith.constant dense<0.000000e+00> : vector<8x32xf32>
    %51 = tpu.matmul %50, %39, %cst_17 {dimension_numbers = #tpu.dot_dimension_numbers<[1], [0], [0], [1], [0, 0, 1, 1], [], []>} : vector<8x8xf32>, vector<8x32xf32>, vector<8x32xf32> -> vector<8x32xf32>
    %52 = vector.extract_strided_slice %6 {offsets = [0, 192], sizes = [8, 64], strides = [1, 1]} : vector<8x640xf32> to vector<8x64xf32>
    %53 = vector.extract_strided_slice %6 {offsets = [0, 448], sizes = [8, 64], strides = [1, 1]} : vector<8x640xf32> to vector<8x64xf32>
    %54 = vector.extract_strided_slice %6 {offsets = [0, 608], sizes = [8, 32], strides = [1, 1]} : vector<8x640xf32> to vector<8x32xf32>
    %cst_18 = arith.constant dense<0.000000e+00> : vector<8x8xf32>
    %55 = tpu.matmul %52, %53, %cst_18 {dimension_numbers = #tpu.dot_dimension_numbers<[1], [1], [0], [0], [0, 0, 1, 0], [], []>} : vector<8x64xf32>, vector<8x64xf32>, vector<8x8xf32> -> vector<8x8xf32>
    %cst_19 = arith.constant dense<0xFF800000> : vector<8xf32>
    %56 = vector.multi_reduction <maximumf>, %55, %cst_19 [1] : vector<8x8xf32> to vector<8xf32>
    %57 = vector.shape_cast %56 : vector<8xf32> to vector<8x1xf32>
    %58 = vector.broadcast %57 : vector<8x1xf32> to vector<8x8xf32>
    %59 = arith.subf %55, %58 : vector<8x8xf32>
    %60 = math.exp %59 : vector<8x8xf32>
    %cst_20 = arith.constant dense<0.000000e+00> : vector<8xf32>
    %61 = vector.multi_reduction <add>, %60, %cst_20 [1] : vector<8x8xf32> to vector<8xf32>
    %62 = vector.shape_cast %61 : vector<8xf32> to vector<8x1xf32>
    %63 = tpu.reciprocal %62 {approx = true} : vector<8x1xf32> -> vector<8x1xf32>
    %64 = vector.broadcast %63 : vector<8x1xf32> to vector<8x8xf32>
    %65 = arith.mulf %60, %64 : vector<8x8xf32>
    %cst_21 = arith.constant dense<0.000000e+00> : vector<8x32xf32>
    %66 = tpu.matmul %65, %54, %cst_21 {dimension_numbers = #tpu.dot_dimension_numbers<[1], [0], [0], [1], [0, 0, 1, 1], [], []>} : vector<8x8xf32>, vector<8x32xf32>, vector<8x32xf32> -> vector<8x32xf32>
    %67 = tpu.concatenate %21, %36, %51, %66 in 1 : vector<8x32xf32>, vector<8x32xf32>, vector<8x32xf32>, vector<8x32xf32> -> vector<8x128xf32>
    %c0_22 = arith.constant 0 : index
    %c0_23 = arith.constant 0 : index
    %c0_24 = arith.constant 0 : index
    %68 = vector.load %arg4[%c0_22, %c0_23, %c0_24] : memref<1x8x128xf32, #tpu.memory_space<vmem>>, vector<1x8x128xf32>
    %69 = vector.shape_cast %68 : vector<1x8x128xf32> to vector<8x128xf32>
    %70 = vector.shape_cast %67 : vector<8x128xf32> to vector<1x8x128xf32>
    tpu.vector_store %arg4[%c0_22, %c0_23, %c0_24], %70 {strides = array<i32>} : memref<1x8x128xf32, #tpu.memory_space<vmem>>, vector<1x8x128xf32>,
    return
  }
  func.func @transform_0(%arg0: i32) -> (i32, i32, i32) {
    %c0_i32 = arith.constant 0 : i32
    %c0_i32_0 = arith.constant 0 : i32
    %c0_i32_1 = arith.constant 0 : i32
    return %arg0, %c0_i32, %c0_i32_0 : i32, i32, i32
  }
  func.func @transform_1(%arg0: i32) -> (i32, i32) {
    %c0_i32 = arith.constant 0 : i32
    %c0_i32_0 = arith.constant 0 : i32
    %c0_i32_1 = arith.constant 0 : i32
    return %c0_i32, %c0_i32_0 : i32, i32
  }
  func.func @transform_2(%arg0: i32) -> (i32, i32) {
    %c0_i32 = arith.constant 0 : i32
    %c0_i32_0 = arith.constant 0 : i32
    %c0_i32_1 = arith.constant 0 : i32
    return %c0_i32, %c0_i32_0 : i32, i32
  }
  func.func @transform_3(%arg0: i32) -> (i32, i32, i32) {
    %c0_i32 = arith.constant 0 : i32
    %c0_i32_0 = arith.constant 0 : i32
    %c0_i32_1 = arith.constant 0 : i32
    return %arg0, %c0_i32, %c0_i32_0 : i32, i32, i32
  }
}

</mosaic_0001>

<bundles_post_ra>
// kernel: tpu_custom_call.1
= control target key start
LH: loop header
LB: loop body
LE: loop exit
PB: predicated region body
PF: predicated region fallthrough
CT: control target
= control target key end

     0   :  { %8 = vsyncpa [#allocation3], 0  ;;  %s1297_s0 = inlined_call_operand.hbm [shape: f32[2,8,128], index: 0, kind: input, shape index: {}]   ;;  %s1298_s1 = inlined_call_operand.hbm [shape: f32[128,640], index: 1, kind: input, shape index: {}]   ;;  %s1299_s2 = inlined_call_operand.hbm [shape: f32[1,640], index: 2, kind: input, shape index: {}]   ;;  %s1300_s3 = inlined_call_operand.hbm [shape: f32[2,8,128], index: 3, kind: output, shape index: {}]  }
   0x1   :  { %10 = vsyncpa [#allocation3 + $0x1], 0 }
   0x2   :  { %11 = vsyncpa [#allocation6], 0 }
   0x3   :  { %12 = vsyncpa [#allocation4], 0 }
   0x4   :  { %14 = vsyncpa [#allocation4 + $0x1], 0  ;;  %s1096_s12 = smov 0   ;;  %s1098_s13 = smov 0  }
   0x5   :  { %s1100_s14 = smov 0   ;;  %s1102_s15 = smov 0  }
   0x6 LB: > { %s130_s18 = sshll.u32 %s1298_s1, 4  ;;  %s1120_s19 = sadd.s32 4294967295, %s1067_s15   ;;  %s1067_s15 = sphi %s1102_s15, %s1311_s15   ;;  %s1063_s14 = sphi %s1100_s14, %s1310_s14   ;;  %s1059_s13 = sphi %s1098_s13, %s1309_s13   ;;  %s1055_s12 = sphi %s1096_s12, %s1308_s12   ;;  %s131_s18 = int_to_ptr.hbm [resolvable:$true] %s130_s18 }
   0x7   : > { %p792_p0 = scmp.ge.s32.totalorder %s1067_s15, 1  ;;  %p41_p1 = scmp.eq.s32.totalorder %s1120_s19, 0 }
   0x8   : > { %p119_p2 = scmp.lt.s32.totalorder %s1067_s15, 3  ;;  %s1069_s21 = smov [#allocation5]  }
   0x9   : > { %s132_s22 = sshll.u32 %s1069_s21, 4  ;;  %s145_s25 = sshll.u32 %s1299_s2, 4  ;;  %s133_s22 = int_to_ptr.vmem [resolvable:$true] %s132_s22  ;;  %s146_s25 = int_to_ptr.hbm [resolvable:$true] %s145_s25 }
   0xa   : > { %p1125_p3 = pnand %p792_p0, %p119_p2  ;;  %s1070_s26 = smov [#allocation7]  }
   0xb   : > { %s147_s27 = sshll.u32 %s1070_s26, 4  ;;  %s1071_s28 = smov 640   ;;  %s148_s27 = int_to_ptr.vmem [resolvable:$true] %s147_s27 }
   0xc   : > { %p831_p4 = pneg %p1125_p3  ;;  %s1072_s29 = smov 40  }
   0xd   : > { %s791_s30 = sadd.s32 4294967294, %s1067_s15   ;;  %s1139_s4 = sadd.s32 1, %s1067_s15  }
   0xe   : > { %p832_p6 = pnand %p831_p4, %p41_p1  ;;  %s24_s5 = ssub.s32 %s1067_s15, %s1139_s4 }
   0xf   : > { %s27_s6 = sadd.s32 1, %s1063_s14  ;;  %p25_p7 = scmp.eq.s32.totalorder %s24_s5, 0 }
  0x10   : > { %834 = dma.hbm_to_vmem [thread:$0]  (!%p832_p6), %s131_s18, 10240, %s133_s22, [#allocation6], %s1071_s28, %s1071_s28, %s1072_s29  }
  0x11   : > { %837 = dma.hbm_to_vmem [thread:$0]  (!%p832_p6), %s146_s25, 80, %s148_s27, [#allocation6]  }
  0x12   : > { %p34_p8 = scmp.ne.s32.totalorder %s1063_s14, %s1059_s13  ;;  %p35_p9 = scmp.eq.s32.totalorder %s1067_s15, 0 }
  0x13   : > { %p40_p10 = scmp.ne.s32.totalorder %s1059_s13, %s1055_s12  ;;  %p106_p13 = scmp.eq.s32.totalorder %s1120_s19, 1 }
  0x14   : > { %s1150_s7 = scalar_select %p25_p7, %s1063_s14, %s27_s6  }
  0x15   : > { %p1152_p11 = por %p35_p9, %p34_p8  ;;  %p1158_p12 = por %p41_p1, %p40_p10 }
  0x16   : > { %p112_p0 = scmp.eq.s32.totalorder %s791_s30, 1  ;;  %p848_p2 = scmp.lt.s32.totalorder %s1067_s15, 2 }
  0x17   : > { %s158_s10 = sand.u32 1, %s1063_s14   ;;  %p1165_p4 = por %p106_p13, %p34_p8 }
  0x18   : > { %p1169_p6 = por %p112_p0, %p40_p10  ;;  %s796_s17 = sshll.u32 %s158_s10, 3 }
  0x19   : > { %s797_s18 = sshll.u32 %s1067_s15, 3  ;;  %s162_s24 = scalar_lea.vmem [#allocation2], %s796_s17 }
  0x1a   : > { %s166_s23 = scalar_lea.hbm %s1297_s0, %s797_s18  ;;  %s170_s25 = sshll.u32 %s162_s24, 4  ;;  %s171_s25 = int_to_ptr.vmem [resolvable:$true] %s170_s25 }
  0x1b   : > { %s168_s26 = sshll.u32 %s166_s23, 4  ;;  %p1179_p7 = pnand %p848_p2, %p1152_p11  ;;  %s169_s26 = int_to_ptr.hbm [resolvable:$true] %s168_s26 }
  0x1c   : > { %s159_s28 = scalar_lea.sflag [#allocation3], %s158_s10  ;;  %s967_s29 = sshra.s32 %s169_s26, 4  ;;  %s968_s29 = int_to_ptr.hbm [resolvable:$true] %s967_s29 }
  0x1d   : > { %s969_s30 = scalar_lea.hbm %s968_s29, 8  ;;  %p971_p9 = pneg %p1179_p7 }
  0x1e   : > { %p970_p8 = scmp.ne.s32.totalorder %s968_s29, %s969_s30  ;;  %s974_s17 = scalar_lea.hbm %s1297_s0, 16 }
  0x1f   : > { %p975_p11 = scmp.lt.s32.totalorder %s968_s29, %s1297_s0  ;;  %p976_p0 = scmp.lt.s32.totalorder %s974_s17, %s969_s30 }
  0x20   : > { %p972_p10 = pnand %p971_p9, %p970_p8 }
  0x21   : > { %p977_p2 = por %p976_p0, %p975_p11 }
  0x22   : > { %p973_p13 = pneg %p972_p10 }
  0x24   : > { %p978_p5 = pnand %p977_p2, %p973_p13 }
  0x26   : > { %981 = shalt.err (!%p978_p5)
}
  0x27   : > { %841 = dma.hbm_to_vmem [thread:$0]  (!%p1179_p7), %s169_s26, 128, %s171_s25, %s159_s28  }
  0x28   : > { %179 = sbr.rel (%p1125_p3) target bundleno = 1381 (0x565), region = 32  ;;  %s1196_s10 = sand.u32 (!%p1125_p3), 1, %s1059_s13  }
  0x29   : > { %s799_s21 = sshll.u32 (!%p1125_p3), %s1196_s10, 3  ;;  %s182_s22 = scalar_lea.sflag (!%p1125_p3), [#allocation3], %s1196_s10 }
  0x2a   : > { %s1202_s23 = scalar_lea.vmem (!%p1125_p3), [#allocation2], %s799_s21 }
  0x2d   : > { %1042 = dma.done.wait (%p1158_p12), %s182_s22, 128  }
  0x2e   : > { %1044 = vsyncadd (%p1158_p12), %s182_s22, 4294967168 }
  0x2f   : > { %1046 = dma.done.wait (%p41_p1), [#allocation6], 10320  }
  0x30   : > { %1048 = vsyncadd (%p41_p1), [#allocation6], 4294956976  ;;  %v297_v0 = vld [vmem:[#allocation5 + $0x268] sm:$0xff]  ;;  %v292_v1 = vld [vmem:[#allocation5 + $0x240] sm:$0xff]  ;;  %vm412_vm0 = vcmask 523264   ;;  %s1073_s20 = smov 64  }
  0x31   : > { %352 = vmatpush.msra.mxu2 %v297_v0  ;;  %v295_v2 = vld [vmem:[#allocation5 + $0x258] sm:$0xff]  ;;  %v290_v4 = vld [vmem:[#allocation5 + $0x230] sm:$0xff]  ;;  %v285_v5 = vld [vmem:[#allocation5 + $0x208] sm:$0xff]  ;;  %vm439_vm1 = vcmask 64512   ;;  %s1074_s9 = smov 96   ;;  %s1075_s24 = smov 32  }
  0x32   : > { %v287_v3 = vld [vmem:[#allocation5 + $0x218] sm:$0xff]  ;;  %312 = vmatpush.msra.mxu0 %v295_v2  ;;  %v282_v6 = vld [vmem:[#allocation5 + $0x1f0] sm:$0xff]  ;;  %v280_v7 = vld [vmem:[#allocation5 + $0x1e0] sm:$0xff]  ;;  %s816_s25 = sshll.u32 %s1120_s19, 3  ;;  %vm680_vm2 = vcmask 261120   ;;  %s218_s29 = scalar_lea.vmem [#allocation8], %s799_s21 }
  0x33   : > { %353 = vmatpush.msra.mxu2 %v292_v1  ;;  %v277_v8 = vld [vmem:[#allocation5 + $0x1c8] sm:$0xff]  ;;  %v275_v9 = vld [vmem:[#allocation5 + $0x1b8] sm:$0xff]  ;;  %v272_v10 = vld [vmem:[#allocation5 + $0x1a0] sm:$0xff]  ;;  %s697_s28 = scalar_lea.hbm %s1300_s3, %s816_s25  ;;  %s699_s30 = sshll.u32 %s218_s29, 4  ;;  %vm683_vm3 = vcmask 785408   ;;  %s700_s30 = int_to_ptr.vmem [resolvable:$true] %s699_s30 }
  0x34   : > { %313 = vmatpush.msra.mxu0 %v290_v4  ;;  %v270_v11 = vld [vmem:[#allocation5 + $0x190] sm:$0xff]  ;;  %v267_v12 = vld [vmem:[#allocation5 + $0x178] sm:$0xff]  ;;  %v265_v13 = vld [vmem:[#allocation5 + $0x168] sm:$0xff]  ;;  %s701_s5 = sshll.u32 %s697_s28, 4  ;;  %s687_s19 = scalar_lea.sflag [#allocation4], %s1196_s10  ;;  %s702_s5 = int_to_ptr.hbm [resolvable:$true] %s701_s5 }
  0x35   : > { %354 = vmatpush.msra.mxu2 %v287_v3  ;;  %v296_v14 = vld [vmem:[#allocation5 + $0x260] sm:$0xff]  ;;  %v291_v15 = vld [vmem:[#allocation5 + $0x238] sm:$0xff]  ;;  %v262_v16 = vld [vmem:[#allocation5 + $0x150] sm:$0xff]  ;;  %s1011_s6 = sshra.s32 %s702_s5, 4  ;;  %s1017_s21 = scalar_lea.hbm %s1300_s3, 16  ;;  %s1012_s6 = int_to_ptr.hbm [resolvable:$true] %s1011_s6 }
  0x36   : > { %314 = vmatpush.msra.mxu0 %v285_v5  ;;  %332 = vmatpush.msra.mxu1 %v296_v14  ;;  %v260_v17 = vld [vmem:[#allocation5 + $0x140] sm:$0xff]  ;;  %v286_v18 = vld [vmem:[#allocation5 + $0x210] sm:$0xff]  ;;  %v257_v19 = vld [vmem:[#allocation5 + $0x128] sm:$0xff]  ;;  %s1013_s17 = scalar_lea.hbm %s1012_s6, 8  ;;  %p1018_p12 = scmp.lt.s32.totalorder %s1012_s6, %s1300_s3 }
  0x37   : > { %355 = vmatpush.msra.mxu2 %v282_v6  ;;  %v255_v20 = vld [vmem:[#allocation5 + $0x118] sm:$0xff]  ;;  %v281_v21 = vld [vmem:[#allocation5 + $0x1e8] sm:$0xff]  ;;  %v252_v22 = vld [vmem:[#allocation5 + $0x100] sm:$0xff]  ;;  %p1014_p1 = scmp.ne.s32.totalorder %s1012_s6, %s1013_s17  ;;  %p1019_p7 = scmp.lt.s32.totalorder %s1017_s21, %s1013_s17 }
  0x38   : > { %315 = vmatpush.msra.mxu0 %v280_v7  ;;  %333 = vmatpush.msra.mxu1 %v291_v15  ;;  %v250_v23 = vld [vmem:[#allocation5 + $0xf0] sm:$0xff]  ;;  %v276_v24 = vld [vmem:[#allocation5 + $0x1c0] sm:$0xff]  ;;  %v247_v25 = vld [vmem:[#allocation5 + $0xd8] sm:$0xff] }
  0x39   : > { %356 = vmatpush.msra.mxu2 %v277_v8  ;;  %v245_v26 = vld [vmem:[#allocation5 + $0xc8] sm:$0xff]  ;;  %v271_v27 = vld [vmem:[#allocation5 + $0x198] sm:$0xff]  ;;  %v242_v28 = vld [vmem:[#allocation5 + $0xb0] sm:$0xff]  ;;  %p1015_p3 = pnand %p1014_p1, %p1165_p4  ;;  %p1020_p8 = por %p1019_p7, %p1018_p12 }
  0x3a   : > { %316 = vmatpush.msra.mxu0 %v275_v9  ;;  %334 = vmatpush.msra.mxu1 %v286_v18  ;;  %v240_v29 = vld [vmem:[#allocation5 + $0xa0] sm:$0xff]  ;;  %v266_v30 = vld [vmem:[#allocation5 + $0x170] sm:$0xff]  ;;  %v237_v31 = vld [vmem:[#allocation5 + $0x88] sm:$0xff] }
  0x3b   : > { %357 = vmatpush.msra.mxu2 %v272_v10  ;;  %v235_v32 = vld [vmem:[#allocation5 + $0x78] sm:$0xff]  ;;  %v261_v33 = vld [vmem:[#allocation5 + $0x148] sm:$0xff]  ;;  %v232_v34 = vld [vmem:[#allocation5 + $0x60] sm:$0xff]  ;;  %p1016_p5 = pneg %p1015_p3 }
  0x3c   : > { %317 = vmatpush.msra.mxu0 %v270_v11  ;;  %335 = vmatpush.msra.mxu1 %v281_v21  ;;  %v230_v35 = vld [vmem:[#allocation5 + $0x50] sm:$0xff]  ;;  %v256_v36 = vld [vmem:[#allocation5 + $0x120] sm:$0xff]  ;;  %v227_v37 = vld [vmem:[#allocation5 + $0x38] sm:$0xff] }
  0x3d   : > { %358 = vmatpush.msra.mxu2 %v267_v12  ;;  %v225_v38 = vld [vmem:[#allocation5 + $0x28] sm:$0xff]  ;;  %v251_v39 = vld [vmem:[#allocation5 + $0xf8] sm:$0xff]  ;;  %v222_v40 = vld [vmem:[#allocation5 + $0x10] sm:$0xff]  ;;  %p1021_p9 = pnand %p1020_p8, %p1016_p5 }
  0x3e   : > { %318 = vmatpush.msra.mxu0 %v265_v13  ;;  %336 = vmatpush.msra.mxu1 %v276_v24  ;;  %v1213_v41 = vld [vmem:[%s1202_s23] sm:$0xff]  ;;  %v220_v42 = vld [vmem:[#allocation5] sm:$0xff]  ;;  %v241_v44 = vld [vmem:[#allocation5 + $0xa8] sm:$0xff] }
  0x3f   : > { %359 = vmatpush.msra.mxu2 %v262_v16  ;;  %v246_v43 = vld [vmem:[#allocation5 + $0xd0] sm:$0xff]  ;;  %v236_v45 = vld [vmem:[#allocation5 + $0x80] sm:$0xff]  ;;  %v231_v46 = vld [vmem:[#allocation5 + $0x58] sm:$0xff] }
  0x40   : > { %319 = vmatpush.msra.mxu0 %v260_v17  ;;  %337 = vmatpush.msra.mxu1 %v271_v27  ;;  %v226_v47 = vld [vmem:[#allocation5 + $0x30] sm:$0xff]  ;;  %v221_v48 = vld [vmem:[#allocation5 + $0x8] sm:$0xff]  ;;  %v299_v51 = vld [vmem:[#allocation5 + $0x278] sm:$0xff] }
  0x41   : > { %360 = vmatpush.msra.mxu2 %v257_v19  ;;  %v298_v49 = vld [vmem:[#allocation5 + $0x270] sm:$0xff]  ;;  %v293_v50 = vld [vmem:[#allocation5 + $0x248] sm:$0xff]  ;;  %v288_v53 = vld [vmem:[#allocation5 + $0x220] sm:$0xff] }
  0x42   : > { %320 = vmatpush.msra.mxu0 %v255_v20  ;;  %338 = vmatpush.msra.mxu1 %v266_v30  ;;  %v294_v52 = vld [vmem:[#allocation5 + $0x250] sm:$0xff]  ;;  %v289_v54 = vld [vmem:[#allocation5 + $0x228] sm:$0xff]  ;;  %v283_v55 = vld [vmem:[#allocation5 + $0x1f8] sm:$0xff] }
  0x43   : > { %361 = vmatpush.msra.mxu2 %v252_v22  ;;  %372 = vmatpush.msra.mxu3 %v298_v49  ;;  %v284_v56 = vld [vmem:[#allocation5 + $0x200] sm:$0xff]  ;;  %v278_v57 = vld [vmem:[#allocation5 + $0x1d0] sm:$0xff]  ;;  %v279_v58 = vld [vmem:[#allocation5 + $0x1d8] sm:$0xff] }
  0x44   : > { %321 = vmatpush.msra.mxu0 %v250_v23  ;;  %339 = vmatpush.msra.mxu1 %v261_v33  ;;  %v273_v59 = vld [vmem:[#allocation5 + $0x1a8] sm:$0xff]  ;;  %v274_v60 = vld [vmem:[#allocation5 + $0x1b0] sm:$0xff]  ;;  %v268_v61 = vld [vmem:[#allocation5 + $0x180] sm:$0xff] }
  0x45   : > { %362 = vmatpush.msra.mxu2 %v247_v25  ;;  %373 = vmatpush.msra.mxu3 %v293_v50  ;;  %v269_v62 = vld [vmem:[#allocation5 + $0x188] sm:$0xff]  ;;  %v263_v63 = vld [vmem:[#allocation5 + $0x158] sm:$0xff]  ;;  %v264_v0 = vld [vmem:[#allocation5 + $0x160] sm:$0xff] }
  0x46   : > { %322 = vmatpush.msra.mxu0 %v245_v26  ;;  %340 = vmatpush.msra.mxu1 %v256_v36  ;;  %v258_v1 = vld [vmem:[#allocation5 + $0x130] sm:$0xff]  ;;  %v1218_v2 = vld [vmem:[#allocation7] sm:$0x1f]  ;;  %v259_v3 = vld [vmem:[#allocation5 + $0x138] sm:$0xff] }
  0x47   : > { %363 = vmatpush.msra.mxu2 %v242_v28  ;;  %374 = vmatpush.msra.mxu3 %v288_v53  ;;  %v253_v4 = vld [vmem:[#allocation5 + $0x108] sm:$0xff]  ;;  %v254_v5 = vld [vmem:[#allocation5 + $0x110] sm:$0xff]  ;;  %v304_v6 = vperm.slane %v1218_v2, 2  ;;  %v248_v7 = vld [vmem:[#allocation5 + $0xe0] sm:$0xff]  ;;  %v302_v8 = vperm.slane %v1218_v2, 0 }
  0x48   : > { %323 = vmatpush.msra.mxu0 %v240_v29  ;;  %341 = vmatpush.msra.mxu1 %v251_v39  ;;  %v249_v9 = vld [vmem:[#allocation5 + $0xe8] sm:$0xff]  ;;  %v243_v11 = vld [vmem:[#allocation5 + $0xb8] sm:$0xff]  ;;  %v238_v14 = vld [vmem:[#allocation5 + $0x90] sm:$0xff]  ;;  %v306_v29 = vperm.slane %v1218_v2, 4 }
  0x49   : > { %364 = vmatpush.msra.mxu2 %v237_v31  ;;  %375 = vmatpush.msra.mxu3 %v283_v55  ;;  %v244_v15 = vld [vmem:[#allocation5 + $0xc0] sm:$0xff]  ;;  %v233_v17 = vld [vmem:[#allocation5 + $0x68] sm:$0xff]  ;;  %v239_v18 = vld [vmem:[#allocation5 + $0x98] sm:$0xff]  ;;  %v305_v31 = vperm.slane %v1218_v2, 3 }
  0x4a   : > { %324 = vmatpush.msra.mxu0 %v235_v32  ;;  %342 = vmatpush.msra.mxu1 %v246_v43  ;;  %v228_v19 = vld [vmem:[#allocation5 + $0x40] sm:$0xff]  ;;  %v223_v20 = vld [vmem:[#allocation5 + $0x18] sm:$0xff]  ;;  %v234_v21 = vld [vmem:[#allocation5 + $0x70] sm:$0xff] }
  0x4b   : > { %365 = vmatpush.msra.mxu2 %v232_v34  ;;  %376 = vmatpush.msra.mxu3 %v278_v57  ;;  %v229_v22 = vld [vmem:[#allocation5 + $0x48] sm:$0xff]  ;;  %v224_v23 = vld [vmem:[#allocation5 + $0x20] sm:$0xff] }
  0x4c   : > { %325 = vmatpush.msra.mxu0 %v230_v35  ;;  %343 = vmatpush.msra.mxu1 %v241_v44 }
  0x4d   : > { %366 = vmatpush.msra.mxu2 %v227_v37  ;;  %377 = vmatpush.msra.mxu3 %v273_v59 }
  0x4e   : > { %326 = vmatpush.msra.mxu0 %v225_v38  ;;  %344 = vmatpush.msra.mxu1 %v236_v45 }
  0x4f   : > { %367 = vmatpush.msra.mxu2 %v222_v40  ;;  %378 = vmatpush.msra.mxu3 %v268_v61 }
  0x50   : > { %368 = vmatmul.f32.vlgmr.msra.gmra.mxu2 %v1213_v41  ;;  %327 = vmatpush.msra.mxu0 %v220_v42 }
  0x51   : > { %328 = vmatmul.f32.vlgmr.msra.gmra.mxu0 %v1213_v41  ;;  %345 = vmatpush.msra.mxu1 %v231_v46 }
  0x52   : > { %392 = vmatpush.msrb.mxu0 %v299_v51  ;;  %379 = vmatpush.msra.mxu3 %v263_v63  ;;  %v303_v51 = vperm.slane %v1218_v2, 1 }
  0x53   : > { %346 = vmatpush.msra.mxu1 %v226_v47 }
  0x54   : > { %393 = vmatpush.msrb.mxu0 %v294_v52  ;;  %380 = vmatpush.msra.mxu3 %v258_v1 }
  0x55   : > { %347 = vmatpush.msra.mxu1 %v221_v48 }
  0x56   : > { %348 = vmatmul.f32.vlgmr.msra.gmra.mxu1 %v1213_v41  ;;  %394 = vmatpush.msrb.mxu0 %v289_v54 }
  0x57   : > { %381 = vmatpush.msra.mxu3 %v253_v4 }
  0x58   : > { %395 = vmatpush.msrb.mxu0 %v284_v56 }
  0x59   : > { %382 = vmatpush.msra.mxu3 %v248_v7 }
  0x5a   : > { %396 = vmatpush.msrb.mxu0 %v279_v58 }
  0x5b   : > { %383 = vmatpush.msra.mxu3 %v243_v11 }
  0x5c   : > { %397 = vmatpush.msrb.mxu0 %v274_v60 }
  0x5d   : > { %384 = vmatpush.msra.mxu3 %v238_v14 }
  0x5e   : > { %398 = vmatpush.msrb.mxu0 %v269_v62 }
  0x5f   : > { %385 = vmatpush.msra.mxu3 %v233_v17 }
  0x60   : > { %399 = vmatpush.msrb.mxu0 %v264_v0 }
  0x61   : > { %386 = vmatpush.msra.mxu3 %v228_v19 }
  0x62   : > { %400 = vmatpush.msrb.mxu0 %v259_v3 }
  0x63   : > { %387 = vmatpush.msra.mxu3 %v223_v20 }
  0x64   : > { %401 = vmatpush.msrb.mxu0 %v254_v5  ;;  %388 = vmatmul.f32.vlgmr.msra.gmra.mxu3 %v1213_v41 }
  0x66   : > { %402 = vmatpush.msrb.mxu0 %v249_v9 }
  0x68   : > { %403 = vmatpush.msrb.mxu0 %v244_v15 }
  0x6a   : > { %404 = vmatpush.msrb.mxu0 %v239_v18 }
  0x6c   : > { %405 = vmatpush.msrb.mxu0 %v234_v21 }
  0x6e   : > { %406 = vmatpush.msrb.mxu0 %v229_v22 }
  0x70   : > { %407 = vmatpush.msrb.mxu0 %v224_v23 }
  0x71   : > { %408 = vmatmul.f32.vlgmr.msrb.gmra.mxu0 %v1213_v41 }
  0xce   : > { %v329_v10 = vpop.f32.mrf.mxu0 }
  0xcf   : > { %v330_v16 = vadd.f32 %v329_v10, %v302_v8 }
  0xd3   : > { %v369_v12 = vpop.f32.mrf.mxu2  ;;  %v349_v25 = vpop.f32.mrf.mxu1 }
  0xd4   : > { %v370_v13 = vadd.f32 %v369_v12, %v304_v6  ;;  %v350_v52 = vadd.f32 %v349_v25, %v303_v51 }
  0xd6   : > { %476 = vrot.lane.b32.xlu0 %v370_v13, %s1073_s20  ;;  %803 = vmatpush.xpose.msk.msrb.mxu1 %vm412_vm0, %v370_v13 }
  0xd9   : > { %804 = vmatmul.msk.f32.vlgmr.msrb.gmra.mxu1 %vm412_vm0, %v330_v16 }
  0xde   : > { %474 = vrot.lane.b32.xlu0 %v330_v16, %s1073_s20 }
  0xe7   : > { %v389_v33 = vpop.f32.mrf.mxu3 }
  0xe8   : > { %v390_v34 = vadd.f32 %v389_v33, %v305_v31 }
  0xee   : > { %v409_v30 = vpop.f32.mrf.mxu0 }
  0xef   : > { %v1233_v32 = vadd.f32 %v409_v30, %v306_v29 }
  0xf1   : > { %469 = vmatpush.msrb.mxu2 %v1233_v32  ;;  %514 = vrot.lane.b32.xlu0 %v1233_v32, %s1074_s9 }
  0xf3   : > { %809 = vmatpush.xpose.msk.msra.mxu2 %vm412_vm0, %v390_v34 }
 0x148   : > { %v477_v24 = vpop.permute.xlu0 %476 }
 0x149   : > { %806 = vmatpush.xpose.msk.msrb.mxu3 %vm412_vm0, %v477_v24 }
 0x150   : > { %v475_v26 = vpop.permute.xlu0 %474 }
 0x151   : > { %807 = vmatmul.msk.f32.vlgmr.msrb.gmra.mxu3 %vm412_vm0, %v475_v26 }
 0x156   : > { %v436_v27 = vpop.f32.mrf.mxu1 }
 0x157   : > { %v440_v28 = vsel %vm439_vm1, %v436_v27, -inf }
 0x158   : > { %441 = vmax.xlane.f32.xlu1 %v440_v28 }
 0x163   : > { %v515_v42 = vpop.permute.xlu0 %514 }
 0x164   : > { %535 = vmatpush.msra.mxu1 %v515_v42 }
 0x1cb   : > { %v442_v35 = vpop.xlane.xlu1 %441 }
 0x1cc   : > { %v443_v36 = vsub.f32 %v436_v27, %v442_v35 }
 0x1ce   : > { %v444_v37 = vmul.f32 1.442695, %v443_v36 }
 0x1d0   : > { %891 = vpow2.f32 %v444_v37 }
 0x1d4   : > { %v499_v38 = vpop.f32.mrf.mxu3 }
 0x1d5   : > { %v502_v39 = vsel %vm439_vm1, %v499_v38, -inf }
 0x1d6   : > { %v892_v40 = vpop.eup %891  ;;  %503 = vmax.xlane.f32.xlu1 %v502_v39 }
 0x1d7   : > { %v446_v41 = vsel %vm439_vm1, %v892_v40, 0.0 }
 0x1d8   : > { %447 = vadd.xlane.f32.xlu2 %v446_v41 }
 0x1ef   : > { %605 = vrot.lane.b32.xlu1 %v390_v34, %s1073_s20 }
 0x249   : > { %v504_v43 = vpop.xlane.xlu1 %503 }
 0x24a   : > { %v505_v44 = vsub.f32 %v499_v38, %v504_v43 }
 0x24b   : > { %v448_v45 = vpop.xlane.xlu2 %447 }
 0x24c   : > { %v506_v46 = vmul.f32 1.442695, %v505_v44  ;;  %893 = vrcp.f32 %v448_v45 }
 0x24e   : > { %895 = vpow2.f32 %v506_v46 }
 0x252   : > { %v894_v47 = vpop.eup %893 }
 0x253   : > { %v450_v48 = vmul.f32 %v894_v47, %v892_v40 }
 0x254   : > { %v896_v49 = vpop.eup %895 }
 0x255   : > { %805 = vmatmul.msk.f32.vlgmr.msrb.gmra.mxu2 %vm439_vm1, %v450_v48  ;;  %v508_v50 = vsel %vm439_vm1, %v896_v49, 0.0 }
 0x256   : > { %509 = vadd.xlane.f32.xlu2 %v508_v50 }
 0x25d   : > { %810 = vmatmul.msk.f32.vlgmr.msra.gmra.mxu2 %vm412_vm0, %v350_v52 }
 0x261   : > { %v606_v53 = vpop.permute.xlu1 %605 }
 0x262   : > { %812 = vmatpush.xpose.msk.msrb.mxu1 %vm412_vm0, %v606_v53 }
 0x26e   : > { %603 = vrot.lane.b32.xlu2 %v350_v52, %s1073_s20 }
 0x2c9   : > { %v510_v54 = vpop.xlane.xlu2 %509 }
 0x2ca   : > { %897 = vrcp.f32 %v510_v54 }
 0x2d0   : > { %v898_v55 = vpop.eup %897 }
 0x2d1   : > { %v512_v56 = vmul.f32 %v898_v55, %v896_v49  ;;  %v604_v58 = vpop.permute.xlu2 %603 }
 0x2d3   : > { %808 = vmatmul.msk.f32.vlgmr.msra.gmra.mxu1 %vm439_vm1, %v512_v56 }
 0x2d8   : > { %v471_v57 = vpop.f32.mrf.mxu2 }
 0x2db   : > { %813 = vmatmul.msk.f32.vlgmr.msrb.gmra.mxu1 %vm412_vm0, %v604_v58 }
 0x2e0   : > { %v563_v59 = vpop.f32.mrf.mxu2 }
 0x2e1   : > { %v566_v60 = vsel %vm439_vm1, %v563_v59, -inf }
 0x2e2   : > { %567 = vmax.xlane.f32.xlu0 %v566_v60 }
 0x350   : > { %v537_v61 = vpop.f32.mrf.mxu1 }
 0x355   : > { %v568_v62 = vpop.xlane.xlu0 %567 }
 0x356   : > { %v569_v63 = vsub.f32 %v563_v59, %v568_v62 }
 0x358   : > { %v570_v0 = vmul.f32 1.442695, %v569_v63  ;;  %v628_v1 = vpop.f32.mrf.mxu1 }
 0x359   : > { %v631_v2 = vsel %vm439_vm1, %v628_v1, -inf }
 0x35a   : > { %899 = vpow2.f32 %v570_v0  ;;  %632 = vmax.xlane.f32.xlu2 %v631_v2 }
 0x360   : > { %v900_v3 = vpop.eup %899 }
 0x361   : > { %v572_v4 = vsel %vm439_vm1, %v900_v3, 0.0 }
 0x362   : > { %573 = vadd.xlane.f32.xlu1 %v572_v4 }
 0x372   : > { %642 = vrot.lane.b32.xlu2 %v1233_v32, %s1075_s24 }
 0x37b   : > { %669 = vrot.lane.b32.xlu1 %v537_v61, %s1075_s24 }
 0x3cd   : > { %v633_v5 = vpop.xlane.xlu2 %632 }
 0x3ce   : > { %v634_v6 = vsub.f32 %v628_v1, %v633_v5 }
 0x3d0   : > { %v635_v7 = vmul.f32 1.442695, %v634_v6 }
 0x3d2   : > { %901 = vpow2.f32 %v635_v7 }
 0x3d5   : > { %v643_v8 = vpop.permute.xlu2 %642  ;;  %v574_v13 = vpop.xlane.xlu1 %573 }
 0x3d6   : > { %663 = vmatpush.msrb.mxu2 %v643_v8 }
 0x3d8   : > { %v902_v9 = vpop.eup %901 }
 0x3d9   : > { %v637_v10 = vsel %vm439_vm1, %v902_v9, 0.0 }
 0x3da   : > { %638 = vadd.xlane.f32.xlu0 %v637_v10 }
 0x3ed   : > { %v670_v21 = vpop.permute.xlu1 %669 }
 0x3ee   : > { %577 = vrot.lane.b32.xlu0 %v1233_v32, %s1073_s20  ;;  %v681_v22 = vsel %vm680_vm2, %v471_v57, %v670_v21 }
 0x44d   : > { %v639_v11 = vpop.xlane.xlu0 %638 }
 0x44e   : > { %903 = vrcp.f32 %v639_v11 }
 0x44f   : > { %905 = vrcp.f32 %v574_v13 }
 0x454   : > { %v904_v12 = vpop.eup %903 }
 0x455   : > { %v641_v14 = vmul.f32 %v904_v12, %v902_v9  ;;  %v906_v15 = vpop.eup %905 }
 0x456   : > { %v576_v16 = vmul.f32 %v906_v15, %v900_v3 }
 0x457   : > { %814 = vmatmul.msk.f32.vlgmr.msrb.gmra.mxu2 %vm439_vm1, %v641_v14 }
 0x460   : > { %v578_v17 = vpop.permute.xlu0 %577 }
 0x461   : > { %598 = vmatpush.msra.mxu3 %v578_v17 }
 0x462   : > { %811 = vmatmul.msk.f32.vlgmr.msra.gmra.mxu3 %vm439_vm1, %v576_v16 }
 0x4da   : > { %v665_v19 = vpop.f32.mrf.mxu2 }
 0x4e5   : > { %v600_v18 = vpop.f32.mrf.mxu3 }
 0x4e6   : > { %673 = vrot.lane.b32.xlu0 %v600_v18, %s1073_s20 }
 0x4ee   : > { %677 = vrot.lane.b32.xlu0 %v665_v19, %s1074_s9 }
 0x558   : > { %v674_v20 = vpop.permute.xlu0 %673 }
 0x559   : > { %v682_v23 = vsel %vm412_vm0, %v681_v22, %v674_v20 }
 0x560   : > { %v678_v24 = vpop.permute.xlu0 %677 }
 0x561   : > { %v684_v25 = vsel %vm683_vm3, %v682_v23, %v678_v24 }
 0x562   : > { %685 = vst [vmem:[%s218_s29] sm:$0xff] %v684_v25 }
 0x563   : > { %1024 = shalt.err (!%p1021_p9)
}
 0x564   : > { %829 = dma.vmem_to_hbm [thread:$0]  (%p1165_p4), %s700_s30, 128, %s702_s5, %s687_s19  }
 0x565 PF: > { %s713_s10 = sand.u32 1, %s1055_s12   ;;  %p1307_p10 = scmp.ge.s32.totalorder %s1067_s15, 2 }
 0x566   : > { %s714_s20 = scalar_lea.sflag [#allocation4], %s713_s10 }
 0x567   : > { %p843_p13 = pnand %p1307_p10, %p1169_p6 }
 0x569   : > { %p844_p11 = pneg %p843_p13 }
 0x56b   : > { %1050 = dma.done.wait (%p844_p11), %s714_s20, 128  }
 0x56c   : > { %1052 = vsyncadd (%p844_p11), %s714_s20, 4294967168  ;;  %p17_p0 = scmp.ge.s32.totalorder %s1139_s4, 4   ;;  %s1308_s12 = smov %s1059_s13 }
 0x56d   : > { %s1309_s13 = smov %s1063_s14  ;;  %s1310_s14 = smov %s1150_s7 }
 0x56e   : > { %s1311_s15 = smov %s1139_s4  ;;  %19 = sbr.rel (!%p17_p0) target bundleno = 6 (0x6), region = 85 }
 0x573   :  { %720 = vsyncpa [#allocation3], 1 }
 0x574   :  { %722 = vsyncpa [#allocation3 + $0x1], 1 }
 0x575   :  { %723 = vsyncpa [#allocation6], 1 }
 0x576   :  { %724 = vsyncpa [#allocation4], 1 }
 0x577   :  { %726 = vsyncpa [#allocation4 + $0x1], 1 }

</bundles_post_ra>
